<compile_context>
chip_gen: v6e
topology: v6e:2x2x1
jax: 0.10.0
libtpu: 0.0.40
codegen_flags: <defaults>
</compile_context>

<pallas_src>
from functools import partial

import numpy as np
import jax
import jax.numpy as jnp
from jax.experimental import pallas as pl
from jax.experimental.pallas import tpu as pltpu


def _sobel_kernel(x_ref, o_ref, gbuf_ref):
    """One grid step processes TB images.

    x_ref    : (TB, 3, H, W)  input block (native dtype), VMEM
    o_ref    : (TB, 2, H, W)  output block (float32), VMEM
    gbuf_ref : (TB, H+9, W+129) float32 scratch holding the zero-padded gray
               plane; gray lives at rows [8, 8+H) and cols [128, 128+W) so the
               interior store is (8,128)-tile aligned and the 1-pixel zero
               border is just the untouched margin of the scratch.
    """
    TB, _, H, W = o_ref.shape

    x = x_ref[...].astype(jnp.float32)                       # (TB, 3, H, W)
    gray = (x[:, 0] + x[:, 1] + x[:, 2]) * jnp.float32(1.0 / 3.0)  # (TB, H, W)

    # Zero-padded grayscale plane, built in VMEM (no wrapper-side pad pass).
    gbuf_ref[...] = jnp.zeros_like(gbuf_ref)
    gbuf_ref[:, 8:8 + H, 128:128 + W] = gray

    def tap(dr, dc):
        # tap(dr, dc)[n, i, j] == gray[n, i+dr, j+dc], zero outside the image.
        return gbuf_ref[:, 8 + dr:8 + dr + H, 128 + dc:128 + dc + W]

    a_m = tap(-1, -1); c_m = tap(-1, +1)        # row i-1, cols j-1 / j+1
    a_0 = tap(0, -1);  c_0 = tap(0, +1)         # row i
    a_p = tap(+1, -1); c_p = tap(+1, +1)        # row i+1
    b_m = tap(-1, 0);  b_p = tap(+1, 0)         # center column, rows i-1 / i+1

    # Separable cross-correlation (padding=1):
    #   out0 = [1,2,1]^T x [1,0,-1]  ;  out1 = [1,0,-1]^T x [1,2,1]
    out0 = (a_m - c_m) + 2.0 * (a_0 - c_0) + (a_p - c_p)
    out1 = (a_m + c_m) - (a_p + c_p) + 2.0 * (b_m - b_p)

    o_ref[:, 0:1, :, :] = jnp.expand_dims(out0, 1).astype(o_ref.dtype)
    o_ref[:, 1:2, :, :] = jnp.expand_dims(out1, 1).astype(o_ref.dtype)


def _pick_tb(B, H, W, in_itemsize, budget_bytes=24 * 1024 * 1024):
    """Largest batch tile (divisor of B) whose double-buffered block fits the
    budget, preferring >= 2 grid steps so megacore (v7x) can split the work."""
    def step_bytes(tb):
        inp = 2 * tb * 3 * H * W * in_itemsize          # double-buffered input
        out = 2 * tb * 2 * H * W * 4                    # double-buffered output
        scr = tb * (H + 9) * (W + 129) * 4              # padded-gray scratch
        return inp + out + scr

    divisors = [d for d in range(1, B + 1) if B % d == 0]
    fits = [d for d in divisors if step_bytes(d) <= budget_bytes] or [1]
    pref = [d for d in fits if B // d >= 2]
    return max(pref) if pref else max(fits)


def sobel(x):
    """Pallas equivalent of Sobel.forward(x).  x: (B, 3, H, W) -> (B, 2, H, W) f32."""
    B, C, H, W = x.shape
    assert C == 3, "Sobel module expects 3 input channels"

    itemsize = jnp.dtype(x.dtype).itemsize
    TB = _pick_tb(B, H, W, itemsize)
    grid = (B // TB,)

    in_spec = pl.BlockSpec((TB, 3, H, W), lambda i: (i, 0, 0, 0))
    out_spec = pl.BlockSpec((TB, 2, H, W), lambda i: (i, 0, 0, 0))

    return pl.pallas_call(
        _sobel_kernel,
        grid=grid,
        in_specs=[in_spec],
        out_specs=out_spec,
        out_shape=jax.ShapeDtypeStruct((B, 2, H, W), jnp.float32),
        scratch_shapes=[pltpu.VMEM((TB, H + 9, W + 129), jnp.float32)],
        compiler_params=pltpu.CompilerParams(
            dimension_semantics=("parallel",),
            vmem_limit_bytes=48 * 1024 * 1024,
        ),
    )(x)


def _reference(x):
    """Pure-JAX reference: grayscale (mean/3) then 2-channel 3x3 conv, pad=1."""
    gray = (x[:, 0] + x[:, 1] + x[:, 2]).astype(jnp.float32) / 3.0
    k0 = jnp.array([[1, 0, -1], [2, 0, -2], [1, 0, -1]], jnp.float32)
    k1 = jnp.array([[1, 2, 1], [0, 0, 0], [-1, -2, -1]], jnp.float32)
    w = jnp.stack([k0, k1])[:, None, :, :]                     # (2, 1, 3, 3) OIHW
    return jax.lax.conv_general_dilated(
        gray[:, None, :, :], w, window_strides=(1, 1),
        padding=[(1, 1), (1, 1)],
        dimension_numbers=("NCHW", "OIHW", "NCHW"))


if __name__ == "__main__":
    key = jax.random.PRNGKey(0)
    x = jax.random.normal(key, (2, 3, 16, 16), dtype=jnp.float32)

    out = sobel(x)
    out = jax.block_until_ready(out)

    ref = _reference(x)
    assert out.shape == (2, 2, 16, 16) and out.dtype == jnp.float32
    np.testing.assert_allclose(np.asarray(out), np.asarray(ref),
                               rtol=1e-4, atol=1e-4)

    print("KERNEL_OK")
</pallas_src>

<mosaic_0001>
module attributes {stable_mosaic.version = 11 : i64} {
  func.func @_sobel_kernel(%arg0: i32, %arg1: memref<1x3x16x16xf32, #tpu.memory_space<vmem>>, %arg2: memref<1x2x16x16xf32, #tpu.memory_space<vmem>>, %arg3: memref<1x25x145xf32, #tpu.memory_space<vmem>>) attributes {dimension_semantics = [#tpu.dimension_semantics<parallel>], iteration_bounds = array<i64: 2>, scalar_prefetch = 0 : i64, scratch_operands = 1 : i64, tpu.core_type = #tpu.core_type<tc>, window_params = [{transform_indices = @transform_0, window_bounds = array<i64: 1, 3, 16, 16>}, {transform_indices = @transform_1, window_bounds = array<i64: 1, 2, 16, 16>}]} {
    %c0 = arith.constant 0 : index
    %c0_0 = arith.constant 0 : index
    %c0_1 = arith.constant 0 : index
    %c0_2 = arith.constant 0 : index
    %0 = vector.load %arg1[%c0, %c0_0, %c0_1, %c0_2] : memref<1x3x16x16xf32, #tpu.memory_space<vmem>>, vector<1x3x16x16xf32>
    %1 = vector.extract_strided_slice %0 {offsets = [0, 0, 0, 0], sizes = [1, 1, 16, 16], strides = [1, 1, 1, 1]} : vector<1x3x16x16xf32> to vector<1x1x16x16xf32>
    %2 = vector.shape_cast %1 : vector<1x1x16x16xf32> to vector<1x16x16xf32>
    %3 = vector.extract_strided_slice %0 {offsets = [0, 1, 0, 0], sizes = [1, 1, 16, 16], strides = [1, 1, 1, 1]} : vector<1x3x16x16xf32> to vector<1x1x16x16xf32>
    %4 = vector.shape_cast %3 : vector<1x1x16x16xf32> to vector<1x16x16xf32>
    %5 = arith.addf %2, %4 : vector<1x16x16xf32>
    %6 = vector.extract_strided_slice %0 {offsets = [0, 2, 0, 0], sizes = [1, 1, 16, 16], strides = [1, 1, 1, 1]} : vector<1x3x16x16xf32> to vector<1x1x16x16xf32>
    %7 = vector.shape_cast %6 : vector<1x1x16x16xf32> to vector<1x16x16xf32>
    %8 = arith.addf %5, %7 : vector<1x16x16xf32>
    %cst = arith.constant 0.333333343 : f32
    %9 = vector.broadcast %cst : f32 to vector<1x16x16xf32>
    %10 = arith.mulf %8, %9 : vector<1x16x16xf32>
    %cst_3 = arith.constant 0.000000e+00 : f32
    %11 = vector.broadcast %cst_3 : f32 to vector<1x25x145xf32>
    %c0_4 = arith.constant 0 : index
    %c0_5 = arith.constant 0 : index
    %c0_6 = arith.constant 0 : index
    %12 = vector.load %arg3[%c0_4, %c0_5, %c0_6] : memref<1x25x145xf32, #tpu.memory_space<vmem>>, vector<1x25x145xf32>
    tpu.vector_store %arg3[%c0_4, %c0_5, %c0_6], %11 {strides = array<i32>} : memref<1x25x145xf32, #tpu.memory_space<vmem>>, vector<1x25x145xf32>,
    %c0_7 = arith.constant 0 : index
    %c8 = arith.constant 8 : index
    %c128 = arith.constant 128 : index
    %13 = vector.load %arg3[%c0_7, %c8, %c128] : memref<1x25x145xf32, #tpu.memory_space<vmem>>, vector<1x16x16xf32>
    tpu.vector_store %arg3[%c0_7, %c8, %c128], %10 {strides = array<i32>} : memref<1x25x145xf32, #tpu.memory_space<vmem>>, vector<1x16x16xf32>,
    %c0_8 = arith.constant 0 : index
    %c7 = arith.constant 7 : index
    %c127 = arith.constant 127 : index
    %14 = vector.load %arg3[%c0_8, %c7, %c127] : memref<1x25x145xf32, #tpu.memory_space<vmem>>, vector<1x16x16xf32>
    %c0_9 = arith.constant 0 : index
    %c7_10 = arith.constant 7 : index
    %c129 = arith.constant 129 : index
    %15 = vector.load %arg3[%c0_9, %c7_10, %c129] : memref<1x25x145xf32, #tpu.memory_space<vmem>>, vector<1x16x16xf32>
    %c0_11 = arith.constant 0 : index
    %c8_12 = arith.constant 8 : index
    %c127_13 = arith.constant 127 : index
    %16 = vector.load %arg3[%c0_11, %c8_12, %c127_13] : memref<1x25x145xf32, #tpu.memory_space<vmem>>, vector<1x16x16xf32>
    %c0_14 = arith.constant 0 : index
    %c8_15 = arith.constant 8 : index
    %c129_16 = arith.constant 129 : index
    %17 = vector.load %arg3[%c0_14, %c8_15, %c129_16] : memref<1x25x145xf32, #tpu.memory_space<vmem>>, vector<1x16x16xf32>
    %c0_17 = arith.constant 0 : index
    %c9 = arith.constant 9 : index
    %c127_18 = arith.constant 127 : index
    %18 = vector.load %arg3[%c0_17, %c9, %c127_18] : memref<1x25x145xf32, #tpu.memory_space<vmem>>, vector<1x16x16xf32>
    %c0_19 = arith.constant 0 : index
    %c9_20 = arith.constant 9 : index
    %c129_21 = arith.constant 129 : index
    %19 = vector.load %arg3[%c0_19, %c9_20, %c129_21] : memref<1x25x145xf32, #tpu.memory_space<vmem>>, vector<1x16x16xf32>
    %c0_22 = arith.constant 0 : index
    %c7_23 = arith.constant 7 : index
    %c128_24 = arith.constant 128 : index
    %20 = vector.load %arg3[%c0_22, %c7_23, %c128_24] : memref<1x25x145xf32, #tpu.memory_space<vmem>>, vector<1x16x16xf32>
    %c0_25 = arith.constant 0 : index
    %c9_26 = arith.constant 9 : index
    %c128_27 = arith.constant 128 : index
    %21 = vector.load %arg3[%c0_25, %c9_26, %c128_27] : memref<1x25x145xf32, #tpu.memory_space<vmem>>, vector<1x16x16xf32>
    %22 = arith.subf %14, %15 : vector<1x16x16xf32>
    %23 = arith.subf %16, %17 : vector<1x16x16xf32>
    %cst_28 = arith.constant 2.000000e+00 : f32
    %24 = vector.broadcast %cst_28 : f32 to vector<1x16x16xf32>
    %25 = arith.mulf %24, %23 : vector<1x16x16xf32>
    %26 = arith.addf %22, %25 : vector<1x16x16xf32>
    %27 = arith.subf %18, %19 : vector<1x16x16xf32>
    %28 = arith.addf %26, %27 : vector<1x16x16xf32>
    %29 = arith.addf %14, %15 : vector<1x16x16xf32>
    %30 = arith.addf %18, %19 : vector<1x16x16xf32>
    %31 = arith.subf %29, %30 : vector<1x16x16xf32>
    %32 = arith.subf %20, %21 : vector<1x16x16xf32>
    %cst_29 = arith.constant 2.000000e+00 : f32
    %33 = vector.broadcast %cst_29 : f32 to vector<1x16x16xf32>
    %34 = arith.mulf %33, %32 : vector<1x16x16xf32>
    %35 = arith.addf %31, %34 : vector<1x16x16xf32>
    %36 = vector.shape_cast %28 : vector<1x16x16xf32> to vector<1x1x16x16xf32>
    %c0_30 = arith.constant 0 : index
    %c0_31 = arith.constant 0 : index
    %c0_32 = arith.constant 0 : index
    %c0_33 = arith.constant 0 : index
    %37 = vector.load %arg2[%c0_30, %c0_31, %c0_32, %c0_33] : memref<1x2x16x16xf32, #tpu.memory_space<vmem>>, vector<1x1x16x16xf32>
    tpu.vector_store %arg2[%c0_30, %c0_31, %c0_32, %c0_33], %36 {strides = array<i32>} : memref<1x2x16x16xf32, #tpu.memory_space<vmem>>, vector<1x1x16x16xf32>,
    %38 = vector.shape_cast %35 : vector<1x16x16xf32> to vector<1x1x16x16xf32>
    %c0_34 = arith.constant 0 : index
    %c1 = arith.constant 1 : index
    %c0_35 = arith.constant 0 : index
    %c0_36 = arith.constant 0 : index
    %39 = vector.load %arg2[%c0_34, %c1, %c0_35, %c0_36] : memref<1x2x16x16xf32, #tpu.memory_space<vmem>>, vector<1x1x16x16xf32>
    tpu.vector_store %arg2[%c0_34, %c1, %c0_35, %c0_36], %38 {strides = array<i32>} : memref<1x2x16x16xf32, #tpu.memory_space<vmem>>, vector<1x1x16x16xf32>,
    return
  }
  func.func @transform_0(%arg0: i32) -> (i32, i32, i32, i32) {
    %c0_i32 = arith.constant 0 : i32
    %c0_i32_0 = arith.constant 0 : i32
    %c0_i32_1 = arith.constant 0 : i32
    %c0_i32_2 = arith.constant 0 : i32
    return %arg0, %c0_i32, %c0_i32_0, %c0_i32_1 : i32, i32, i32, i32
  }
  func.func @transform_1(%arg0: i32) -> (i32, i32, i32, i32) {
    %c0_i32 = arith.constant 0 : i32
    %c0_i32_0 = arith.constant 0 : i32
    %c0_i32_1 = arith.constant 0 : i32
    %c0_i32_2 = arith.constant 0 : i32
    return %arg0, %c0_i32, %c0_i32_0, %c0_i32_1 : i32, i32, i32, i32
  }
}

</mosaic_0001>

<bundles_post_ra>
// kernel: tpu_custom_call.1
= control target key start
LH: loop header
LB: loop body
LE: loop exit
PB: predicated region body
PF: predicated region fallthrough
CT: control target
= control target key end

     0   :  { %6 = vsyncpa [#allocation4], 0  ;;  %s921_s0 = inlined_call_operand.hbm [shape: f32[2,3,16,16], index: 0, kind: input, shape index: {}]   ;;  %s922_s1 = inlined_call_operand.hbm [shape: f32[2,2,16,16], index: 1, kind: output, shape index: {}]  }
   0x1   :  { %8 = vsyncpa [#allocation4 + $0x1], 0 }
   0x2   :  { %9 = vsyncpa [#allocation5], 0 }
   0x3   :  { %11 = vsyncpa [#allocation5 + $0x1], 0  ;;  %s667_s6 = smov 0   ;;  %s669_s7 = smov 0  }
   0x4   :  { %s671_s8 = smov 0   ;;  %s673_s9 = smov 0  }
   0x5 LB: > { %s688_s10 = sadd.s32 4294967295, %s645_s9   ;;  %s481_s11 = sadd.s32 4294967294, %s645_s9   ;;  %s645_s9 = sphi %s673_s9, %s936_s9   ;;  %s641_s8 = sphi %s671_s8, %s935_s8   ;;  %s637_s7 = sphi %s669_s7, %s934_s7   ;;  %s633_s6 = sphi %s667_s6, %s933_s6  }
   0x6   : > { %s692_s12 = sadd.s32 1, %s645_s9   ;;  %s24_s13 = sadd.s32 1, %s641_s8 }
   0x7   : > { %s21_s14 = ssub.s32 %s645_s9, %s692_s12  ;;  %p31_p0 = scmp.ne.s32.totalorder %s641_s8, %s637_s7 }
   0x8   : > { %p22_p1 = scmp.eq.s32.totalorder %s21_s14, 0  ;;  %p32_p2 = scmp.eq.s32.totalorder %s645_s9, 0 }
   0x9   : > { %p37_p3 = scmp.ne.s32.totalorder %s637_s7, %s633_s6  ;;  %p38_p4 = scmp.eq.s32.totalorder %s688_s10, 0 }
   0xa   : > { %s704_s15 = scalar_select %p22_p1, %s641_s8, %s24_s13  }
   0xb   : > { %p33_p5 = por %p32_p2, %p31_p0  ;;  %p706_p6 = por %p38_p4, %p37_p3 }
   0xc   : > { %p61_p7 = scmp.eq.s32.totalorder %s688_s10, 1  ;;  %p67_p8 = scmp.eq.s32.totalorder %s481_s11, 1 }
   0xd   : > { %s925_s16 = scalar_select %p706_p6, 1, 0 }
   0xe   : > { %p511_p10 = scmp.lt.s32.totalorder %s645_s9, 2  ;;  %p713_p11 = por %p61_p7, %p31_p0 }
   0xf   : > { %p717_p12 = por %p67_p8, %p37_p3  ;;  %s87_s19 = sand.u32 1, %s641_s8  }
  0x10   : > { %s926_s17 = scalar_select %p713_p11, 1, 0 }
  0x11   : > { %s927_s18 = scalar_select %p717_p12, 1, 0 }
  0x12   : > { %s497_s20 = smul.u32 768, %s645_s9  ;;  %p728_p13 = pnand %p511_p10, %p33_p5 }
  0x13   : > { %s496_s21 = smul.u32 48, %s87_s19  ;;  %s734_s28 = scalar_lea.sflag [#allocation4], %s87_s19 }
  0x14   : > { %s726_s24 = scalar_lea.hbm %s921_s0, %s497_s20  ;;  %p555_p1 = pneg %p728_p13 }
  0x15   : > { %s91_s26 = scalar_lea.vmem [#allocation3], %s496_s21  ;;  %s553_s29 = scalar_lea.hbm %s726_s24, 768 }
  0x16   : > { %s98_s27 = sshll.u32 %s91_s26, 4  ;;  %p554_p0 = scmp.ne.s32.totalorder %s726_s24, %s553_s29  ;;  %s732_s27 = int_to_ptr.vmem [resolvable:$true] %s98_s27 }
  0x17   : > { %s558_s3 = scalar_lea.hbm %s921_s0, 1536  ;;  %p559_p4 = scmp.lt.s32.totalorder %s726_s24, %s921_s0 }
  0x18   : > { %p556_p2 = pnand %p555_p1, %p554_p0  ;;  %p560_p5 = scmp.lt.s32.totalorder %s558_s3, %s553_s29 }
  0x1a   : > { %p557_p3 = pneg %p556_p2  ;;  %p561_p7 = por %p560_p5, %p559_p4 }
  0x1c   : > { %p562_p8 = pnand %p561_p7, %p557_p3 }
  0x1e   : > { %565 = shalt.err (!%p562_p8)
}
  0x1f   : > { %s566_s11 = scalar_lea.vmem %s732_s27, 768  ;;  %s647_s13 = smov [#allocation3]  }
  0x20   : > { %p567_p10 = scmp.ne.s32.totalorder %s732_s27, %s566_s11  ;;  %s571_s14 = sshll.u32 %s647_s13, 4  ;;  %s572_s14 = int_to_ptr.vmem [resolvable:$false] %s571_s14 }
  0x21   : > { %s573_s19 = scalar_lea.vmem %s572_s14, 1536  ;;  %p574_p2 = scmp.lt.s32.totalorder %s732_s27, %s572_s14 }
  0x22   : > { %p569_p9 = pnand %p567_p10, %p555_p1  ;;  %p575_p12 = scmp.lt.s32.totalorder %s573_s19, %s566_s11 }
  0x24   : > { %p570_p0 = pneg %p569_p9  ;;  %p576_p11 = por %p575_p12, %p574_p2 }
  0x26   : > { %p577_p6 = pnand %p576_p11, %p570_p0 }
  0x28   : > { %580 = shalt.err (!%p577_p6)
}
  0x29   : > { %s648_s20 = smov 128   ;;  %s649_s21 = smov 8  }
  0x2a   : > { %506 = dma.hbm_to_vmem [thread:$0]  (!%p728_p13), %s726_s24, 768, %s732_s27, %s734_s28, %s648_s20, %s648_s20, %s649_s21  }
  0x2b   : > { %p485_p9 = scmp.ge.s32.totalorder %s645_s9, 1  ;;  %p106_p1 = scmp.lt.s32.totalorder %s645_s9, 3 }
  0x2d   : > { %p107_p3 = pnand %p485_p9, %p106_p1 }
  0x2e   : > { %s758_s22 = sand.u32 (!%p107_p3), 1, %s637_s7   ;;  %p929_p6 = scmp.ne.s32.totalorder (!%p107_p3), %s925_s16, 0 }
  0x2f   : > { %110 = sbr.rel (%p107_p3) target bundleno = 347 (0x15b), region = 24  ;;  %s113_s26 = scalar_lea.sflag (!%p107_p3), [#allocation4], %s758_s22 }
  0x30   : > { %s498_s23 = smul.u32 (!%p107_p3), 48, %s758_s22 }
  0x32   : > { %s116_s29 = scalar_lea.vmem (!%p107_p3), [#allocation3], %s498_s23 }
  0x34   : > { %624 = dma.done.wait (%p929_p6), %s113_s26, 768  }
  0x35   : > { %626 = vsyncadd (%p929_p6), %s113_s26, 4294966528  ;;  %vm155_vm0 = vcmask 131072   ;;  %vm148_vm1 = vcmask 138240   ;;  %v650_v0 = vmov 0.0   ;;  %v135_v1 = vld [vmem:[%s116_s29] sm:$0xff]  ;;  %v137_v2 = vld [vmem:[%s116_s29 + $0x10] sm:$0xff] }
  0x36   : > { %156 = vst.msk [vmem:[#allocation2 + $0x38] sm:$0x1] %vm155_vm0, %v650_v0  ;;  %147 = vst [vmem:[#allocation2] sm:$0xff] %v650_v0  ;;  %v139_v3 = vld [vmem:[%s116_s29 + $0x20] sm:$0xff]  ;;  %v141_v5 = vadd.f32 %v137_v2, %v135_v1  ;;  %v136_v6 = vld [vmem:[%s116_s29 + $0x8] sm:$0xff]  ;;  %s651_s16 = smov 126  }
  0x37   : > { %150 = vst [vmem:[#allocation2 + $0x10] sm:$0xff] %v650_v0  ;;  %152 = vst [vmem:[#allocation2 + $0x20] sm:$0xff] %v650_v0  ;;  %v138_v7 = vld [vmem:[%s116_s29 + $0x18] sm:$0xff]  ;;  %v140_v8 = vld [vmem:[%s116_s29 + $0x28] sm:$0xff]  ;;  %vm157_vm2 = vcmask 130048   ;;  %vm241_vm3 = vcmask 1045504  }
  0x38   : > { %154 = vst [vmem:[#allocation2 + $0x30] sm:$0x1] %v650_v0  ;;  %151 = vst.msk [vmem:[#allocation2 + $0x18] sm:$0xff] %vm148_vm1, %v650_v0  ;;  %v142_v9 = vadd.f32 %v138_v7, %v136_v6  ;;  %v143_v10 = vadd.f32 %v141_v5, %v139_v3  ;;  %s652_s24 = smov 127   ;;  %s653_s25 = smov 1   ;;  %vm204_vm4 = vcmask 1046528  }
  0x39   : > { %149 = vst.msk [vmem:[#allocation2 + $0x8] sm:$0xff] %vm148_vm1, %v650_v0  ;;  %153 = vst.msk [vmem:[#allocation2 + $0x28] sm:$0xff] %vm148_vm1, %v650_v0  ;;  %s486_s27 = sshll.u32 %s758_s22, 5  ;;  %vm354_vm5 = vcmask 7168   ;;  %vm361_vm6 = vcmask 130055   ;;  %vm364_vm7 = vcmask 129024  }
  0x3a   : > { %v144_v11 = vadd.f32 %v142_v9, %v140_v8  ;;  %v145_v12 = vmul.f32 0.33333334, %v143_v10  ;;  %s134_s28 = scalar_lea.vmem [#allocation6], %s486_s27  ;;  %s495_s2 = sshll.u32 %s688_s10, 9 }
  0x3b   : > { %s408_s30 = sshll.u32 %s134_s28, 4  ;;  %s876_s5 = scalar_lea.hbm %s922_s1, %s495_s2  ;;  %s870_s30 = int_to_ptr.vmem [resolvable:$true] %s408_s30 }
  0x3c   : > { %v146_v13 = vmul.f32 0.33333334, %v144_v11  ;;  %158 = vst.msk [vmem:[#allocation2 + $0x18] sm:$0xff] %vm157_vm2, %v145_v12  ;;  %s395_s10 = scalar_lea.sflag [#allocation5], %s758_s22  ;;  %s581_s11 = scalar_lea.vmem %s870_s30, 512 }
  0x3d   : > { %v766_v4 = vld [vmem:[#allocation2 + $0x38] sm:$0x1]  ;;  %v160_v42 = vld [vmem:[#allocation2] sm:$0x80]  ;;  %p582_p11 = scmp.ne.s32.totalorder %s870_s30, %s581_s11  ;;  %p930_p12 = scmp.ne.s32.totalorder %s926_s17, 0 }
  0x3e   : > { %227 = vrot.lane.b32.xlu1 %v766_v4, %s651_s16  ;;  %159 = vst.msk [vmem:[#allocation2 + $0x28] sm:$0xff] %vm157_vm2, %v146_v13  ;;  %v307_v18 = vrot.slane %v766_v4, 2  ;;  %v168_v31 = vld [vmem:[#allocation2 + $0x10] sm:$0xfe]  ;;  %v164_v63 = vld [vmem:[#allocation2 + $0x20] sm:$0x7f] }
  0x3f   : > { %v170_v8 = vld [vmem:[#allocation2 + $0x30] sm:$0x1]  ;;  %p583_p13 = pnand %p582_p11, %p930_p12  ;;  %s654_s13 = smov [#allocation6]  }
  0x40   : > { %v778_v21 = vld [vmem:[#allocation2 + $0x8] sm:$0x80]  ;;  %s585_s14 = sshll.u32 %s654_s13, 4  ;;  %s586_s14 = int_to_ptr.vmem [resolvable:$false] %s585_s14 }
  0x41   : > { %p584_p4 = pneg %p583_p13  ;;  %s587_s19 = scalar_lea.vmem %s586_s14, 1024 }
  0x42   : > { %p588_p5 = scmp.lt.s32.totalorder %s870_s30, %s586_s14  ;;  %p589_p7 = scmp.lt.s32.totalorder %s587_s19, %s581_s11 }
  0x43   : > { %v163_v14 = vld [vmem:[#allocation2 + $0x18] sm:$0xff] }
  0x44   : > { %v771_v15 = vld [vmem:[#allocation2 + $0x18] sm:$0xfe]  ;;  %177 = vrot.lane.b32.xlu0 %v163_v14, %s651_s16  ;;  %p590_p8 = por %p589_p7, %p588_p5 }
  0x45   : > { %225 = vrot.lane.b32.xlu1 %v771_v15, %s651_s16  ;;  %v304_v16 = vrot.slane %v771_v15, 2  ;;  %v167_v17 = vld [vmem:[#allocation2 + $0x28] sm:$0xff] }
  0x46   : > { %v305_v19 = vrot.slane %v167_v17, 2  ;;  %v776_v20 = vld [vmem:[#allocation2 + $0x28] sm:$0x7f]  ;;  %p591_p10 = pnand %p590_p8, %p584_p4 }
  0x47   : > { %v312_v24 = vsub.f32 %v778_v21, %v304_v16 }
  0x48   : > { %v306_v22 = vsel %vm241_vm3, %v304_v16, %v305_v19  ;;  %191 = vrot.lane.b32.xlu0 %v167_v17, %s651_s16  ;;  %v308_v25 = vsel %vm241_vm3, %v305_v19, %v307_v18 }
  0x49   : > { %179 = vrot.lane.b32.xlu1 %v776_v20, %s651_s16  ;;  %v313_v23 = vsub.f32 %v163_v14, %v306_v22  ;;  %v315_v27 = vmul.f32 2.0, %v312_v24  ;;  %v314_v28 = vsub.f32 %v776_v20, %v308_v25 }
  0x4b   : > { %v316_v26 = vmul.f32 2.0, %v313_v23  ;;  %v317_v29 = vmul.f32 2.0, %v314_v28 }
  0x4c   : > { %175 = vrot.lane.b32.xlu0 %v778_v21, %s651_s16 }
  0x4d   : > { %323 = vrot.lane.b32.xlu1 %v316_v26, %s652_s24 }
  0x50   : > { %321 = vrot.lane.b32.xlu0 %v315_v27, %s652_s24 }
  0x54   : > { %325 = vrot.lane.b32.xlu0 %v317_v29, %s652_s24 }
  0xb0   : > { %v786_v30 = vpop.permute.xlu1 %227 }
  0xb1   : > { %v274_v24 = vadd.f32 %v786_v30, %v170_v8  ;;  %v275_v25 = vadd.f32 %v786_v30, %v766_v4 }
  0xb6   : > { %v788_v32 = vpop.permute.xlu0 %177 }
  0xb7   : > { %v226_v33 = vpop.permute.xlu1 %225  ;;  %v186_v38 = vsub.f32 0.0, %v788_v32  ;;  %v798_v39 = vsub.f32 %v163_v14, %v788_v32  ;;  %v267_v55 = vadd.f32 %v788_v32, %v163_v14 }
  0xb8   : > { %v270_v34 = vadd.f32 %v226_v33, %v168_v31  ;;  %v271_v35 = vadd.f32 %v226_v33, %v771_v15  ;;  %v231_v9 = vsub.f32 %v168_v31, %v226_v33  ;;  %v232_v10 = vsub.f32 %v771_v15, %v226_v33 }
  0xb9   : > { %v196_v51 = vmul.f32 2.0, %v186_v38  ;;  %v197_v52 = vmul.f32 2.0, %v798_v39  ;;  %v234_v15 = vsub.f32 %v766_v4, %v786_v30 }
  0xba   : > { %v791_v36 = vpop.permute.xlu0 %191  ;;  %v282_v40 = vrot.slane %v270_v34, 2  ;;  %v283_v41 = vrot.slane %v271_v35, 2  ;;  %v243_v22 = vrot.slane %v232_v10, 2  ;;  %v242_v23 = vrot.slane %v231_v9, 2 }
  0xbb   : > { %v794_v37 = vadd.f32 %v791_v36, %v167_v17  ;;  %v194_v43 = vsub.f32 0.0, %v791_v36  ;;  %v802_v44 = vsub.f32 %v167_v17, %v791_v36  ;;  %v284_v45 = vrot.slane %v791_v36, 2  ;;  %v806_v47 = vpop.permute.xlu1 %179 }
  0xbc   : > { %v206_v6 = vrot.slane %v197_v52, 1  ;;  %v205_v7 = vrot.slane %v196_v51, 1  ;;  %v188_v11 = vsub.f32 %v164_v63, %v806_v47  ;;  %v189_v12 = vsub.f32 %v776_v20, %v806_v47 }
  0xbd   : > { %v286_v46 = vrot.slane %v794_v37, 2  ;;  %v285_v53 = vsel %vm241_vm3, %v282_v40, %v284_v45  ;;  %v198_v58 = vmul.f32 2.0, %v194_v43  ;;  %v199_v59 = vmul.f32 2.0, %v802_v44 }
  0xbe   : > { %v176_v48 = vpop.permute.xlu0 %175  ;;  %v300_v0 = vsub.f32 %v788_v32, %v285_v53  ;;  %v244_v26 = vrot.slane %v194_v43, 2  ;;  %v246_v27 = vrot.slane %v802_v44, 2  ;;  %v250_v35 = vrot.slane %v234_v15, 2 }
  0xbf   : > { %v264_v49 = vadd.f32 %v176_v48, %v160_v42  ;;  %v265_v50 = vadd.f32 %v176_v48, %v778_v21  ;;  %v287_v54 = vsel %vm241_vm3, %v283_v41, %v286_v46  ;;  %v184_v60 = vsub.f32 %v160_v42, %v176_v48  ;;  %v324_v5 = vpop.permute.xlu1 %323 }
  0xc0   : > { %v185_v61 = vsub.f32 %v778_v21, %v176_v48  ;;  %v301_v1 = vsub.f32 %v267_v55, %v287_v54  ;;  %v332_v16 = vadd.f32 %v324_v5, %v300_v0  ;;  %v209_v18 = vrot.slane %v199_v59, 1 }
  0xc1   : > { %v298_v56 = vsub.f32 %v264_v49, %v282_v40  ;;  %v299_v57 = vsub.f32 %v265_v50, %v283_v41  ;;  %v217_v14 = vadd.f32 %v205_v7, %v184_v60  ;;  %v207_v19 = vrot.slane %v198_v58, 1 }
  0xc2   : > { %v322_v62 = vpop.permute.xlu0 %321  ;;  %v218_v13 = vadd.f32 %v206_v6, %v185_v61  ;;  %v333_v17 = vadd.f32 %v324_v5, %v301_v1  ;;  %v233_v21 = vsub.f32 %v170_v8, %v786_v30  ;;  %v222_v31 = vadd.f32 %v209_v18, %v189_v12 }
  0xc3   : > { %v330_v2 = vadd.f32 %v322_v62, %v298_v56  ;;  %v331_v3 = vadd.f32 %v322_v62, %v299_v57  ;;  %v258_v29 = vadd.f32 %v242_v23, %v217_v14  ;;  %v221_v33 = vadd.f32 %v207_v19, %v188_v11 }
  0xc4   : > { %v259_v28 = vadd.f32 %v243_v22, %v218_v13  ;;  %v248_v34 = vrot.slane %v233_v21, 2  ;;  %v210_v40 = vsel %vm204_vm4, %v206_v6, %v209_v18  ;;  %v208_v41 = vsel %vm204_vm4, %v205_v7, %v207_v19 }
  0xc5   : > { %374 = vrot.lane.b32.xlu0 %v331_v3, %s653_s25  ;;  %372 = vrot.lane.b32.xlu1 %v330_v2, %s653_s25  ;;  %v251_v42 = vsel %vm241_vm3, %v246_v27, %v250_v35  ;;  %v220_v43 = vadd.f32 %v210_v40, %v798_v39  ;;  %v219_v44 = vadd.f32 %v208_v41, %v186_v38  ;;  %v288_v49 = vrot.slane %v274_v24, 2 }
  0xc6   : > { %v249_v48 = vsel %vm241_vm3, %v244_v26, %v248_v34  ;;  %v263_v4 = vadd.f32 %v251_v42, %v222_v31  ;;  %v290_v50 = vrot.slane %v275_v25, 2  ;;  %v268_v51 = vadd.f32 %v806_v47, %v164_v63 }
  0xc7   : > { %v262_v30 = vadd.f32 %v249_v48, %v221_v33  ;;  %v269_v52 = vadd.f32 %v806_v47, %v776_v20  ;;  %v289_v53 = vsel %vm241_vm3, %v284_v45, %v288_v49  ;;  %v247_v38 = vsel %vm241_vm3, %v243_v22, %v246_v27  ;;  %v326_v20 = vpop.permute.xlu0 %325 }
  0xc8   : > { %v291_v32 = vsel %vm241_vm3, %v286_v46, %v290_v50  ;;  %v245_v39 = vsel %vm241_vm3, %v242_v23, %v244_v26  ;;  %v261_v54 = vadd.f32 %v247_v38, %v220_v43  ;;  %v302_v47 = vsub.f32 %v268_v51, %v289_v53 }
  0xc9   : > { %378 = vrot.lane.b32.xlu0 %v333_v17, %s653_s25  ;;  %376 = vrot.lane.b32.xlu1 %v332_v16, %s653_s25  ;;  %v260_v55 = vadd.f32 %v245_v39, %v219_v44  ;;  %v303_v56 = vsub.f32 %v269_v52, %v291_v32 }
  0xca   : > { %v334_v36 = vadd.f32 %v326_v20, %v302_v47 }
  0xcb   : > { %v335_v57 = vadd.f32 %v326_v20, %v303_v56 }
  0xcd   : > { %344 = vrot.lane.b32.xlu0 %v259_v28, %s653_s25  ;;  %342 = vrot.lane.b32.xlu1 %v258_v29, %s653_s25 }
  0xd1   : > { %352 = vrot.lane.b32.xlu0 %v263_v4, %s653_s25  ;;  %350 = vrot.lane.b32.xlu1 %v262_v30, %s653_s25 }
  0xd5   : > { %348 = vrot.lane.b32.xlu0 %v261_v54, %s653_s25  ;;  %346 = vrot.lane.b32.xlu1 %v260_v55, %s653_s25 }
  0xd9   : > { %382 = vrot.lane.b32.xlu0 %v335_v57, %s653_s25  ;;  %380 = vrot.lane.b32.xlu1 %v334_v36, %s653_s25 }
 0x137   : > { %v375_v37 = vpop.permute.xlu0 %374  ;;  %v373_v45 = vpop.permute.xlu1 %372 }
 0x138   : > { %v384_v46 = vsel %vm354_vm5, %v373_v45, %v375_v37 }
 0x139   : > { %487 = vst.msk [vmem:[%s134_s28 + $0x9] sm:$0x80] %vm361_vm6, %v384_v46 }
 0x13b   : > { %v379_v58 = vpop.permute.xlu0 %378  ;;  %v377_v59 = vpop.permute.xlu1 %376 }
 0x13c   : > { %v385_v60 = vsel %vm354_vm5, %v377_v59, %v379_v58 }
 0x13d   : > { %488 = vst.msk [vmem:[%s134_s28 + $0x11] sm:$0xff] %vm157_vm2, %v385_v60 }
 0x13f   : > { %v345_v61 = vpop.permute.xlu0 %344  ;;  %v343_v62 = vpop.permute.xlu1 %342 }
 0x140   : > { %v355_v63 = vsel %vm354_vm5, %v343_v62, %v345_v61 }
 0x141   : > { %362 = vst.msk [vmem:[%s134_s28 - $0x7] sm:$0x80] %vm361_vm6, %v355_v63 }
 0x143   : > { %v353_v0 = vpop.permute.xlu0 %352  ;;  %v351_v1 = vpop.permute.xlu1 %350 }
 0x144   : > { %v357_v2 = vsel %vm354_vm5, %v351_v1, %v353_v0 }
 0x145   : > { %365 = vst.msk [vmem:[%s134_s28 + $0x9] sm:$0x7f] %vm364_vm7, %v357_v2 }
 0x147   : > { %v349_v3 = vpop.permute.xlu0 %348  ;;  %v347_v5 = vpop.permute.xlu1 %346 }
 0x148   : > { %v356_v6 = vsel %vm354_vm5, %v347_v5, %v349_v3 }
 0x149   : > { %363 = vst.msk [vmem:[%s134_s28 + $0x1] sm:$0xff] %vm157_vm2, %v356_v6 }
 0x14b   : > { %v383_v7 = vpop.permute.xlu0 %382  ;;  %v381_v8 = vpop.permute.xlu1 %380 }
 0x14c   : > { %v386_v9 = vsel %vm354_vm5, %v381_v8, %v383_v7 }
 0x14d   : > { %489 = vst.msk [vmem:[%s134_s28 + $0x19] sm:$0x7f] %vm364_vm7, %v386_v9 }
 0x14e   : > { %594 = shalt.err (!%p591_p10)
}
 0x14f   : > { %s595_s20 = scalar_lea.hbm %s876_s5, 512  ;;  %s599_s26 = scalar_lea.hbm %s922_s1, 1024 }
 0x150   : > { %p596_p0 = scmp.ne.s32.totalorder %s876_s5, %s595_s20  ;;  %p600_p1 = scmp.lt.s32.totalorder %s876_s5, %s922_s1 }
 0x151   : > { %p601_p3 = scmp.lt.s32.totalorder %s599_s26, %s595_s20 }
 0x152   : > { %p597_p2 = pnand %p596_p0, %p930_p12 }
 0x153   : > { %p602_p6 = por %p601_p3, %p600_p1 }
 0x154   : > { %p598_p9 = pneg %p597_p2 }
 0x156   : > { %p603_p11 = pnand %p602_p6, %p598_p9 }
 0x158   : > { %606 = shalt.err (!%p603_p11)
}
 0x159   : > { %s655_s24 = smov 128   ;;  %s656_s25 = smov 8  }
 0x15a   : > { %501 = dma.vmem_to_hbm [thread:$0]  (%p930_p12), %s870_s30, 512, %s876_s5, %s395_s10, %s655_s24, %s655_s24, %s656_s25  }
 0x15b PF: > { %s423_s27 = sand.u32 1, %s633_s6   ;;  %p931_p13 = scmp.ne.s32.totalorder %s927_s18, 0 }
 0x15c   : > { %p932_p4 = scmp.ge.s32.totalorder %s645_s9, 2  ;;  %s424_s28 = scalar_lea.sflag [#allocation5], %s423_s27 }
 0x15e   : > { %p508_p5 = pnand %p932_p4, %p931_p13 }
 0x160   : > { %p509_p7 = pneg %p508_p5 }
 0x162   : > { %628 = dma.done.wait (%p509_p7), %s424_s28, 512  }
 0x163   : > { %630 = vsyncadd (%p509_p7), %s424_s28, 4294966784  ;;  %p14_p8 = scmp.ge.s32.totalorder %s692_s12, 4   ;;  %s933_s6 = smov %s637_s7 }
 0x164   : > { %s934_s7 = smov %s641_s8  ;;  %s935_s8 = smov %s704_s15 }
 0x165   : > { %s936_s9 = smov %s692_s12  ;;  %16 = sbr.rel (!%p14_p8) target bundleno = 5 (0x5), region = 70 }
 0x16a   :  { %429 = vsyncpa [#allocation4], 1 }
 0x16b   :  { %431 = vsyncpa [#allocation4 + $0x1], 1 }
 0x16c   :  { %432 = vsyncpa [#allocation5], 1 }
 0x16d   :  { %434 = vsyncpa [#allocation5 + $0x1], 1 }

</bundles_post_ra>
